<compile_context>
chip_gen: v7x
topology: tpu7x:2x2x1
jax: 0.10.0
libtpu: 0.0.40
codegen_flags: <defaults>
</compile_context>

<pallas_src>
import functools

import jax
import jax.numpy as jnp
from jax.experimental import pallas as pl
from jax.experimental.pallas import tpu as pltpu


# ---------------------------------------------------------------------------
# Fused Pallas kernel
# ---------------------------------------------------------------------------

def _fused_mma_kernel(*refs, heads, dim_head, scale, self_attn):
    """One batch-block per grid step: projections + attention + out proj.

    refs = (x, [ctx], w_q, w_kv, w_out, b_out, out).  In the self-attention
    path the context operand is omitted so the same block is not DMA'd twice.
    """
    if self_attn:
        x_ref, wq_ref, wkv_ref, wout_ref, bout_ref, o_ref = refs
        ctx_ref = x_ref
    else:
        x_ref, ctx_ref, wq_ref, wkv_ref, wout_ref, bout_ref, o_ref = refs

    inner = heads * dim_head
    bb, n_q, qd = x_ref.shape
    _, n_k, cd = ctx_ref.shape
    out_dim = wout_ref.shape[1]

    # MXU operands in bf16 (weights already bf16); f32 accumulation on MXU.
    x2 = x_ref[...].astype(jnp.bfloat16).reshape(bb * n_q, qd)
    w_q = wq_ref[...]                       # (qd, inner)      bf16
    w_kv = wkv_ref[...]                     # (cd, 2*inner)    bf16
    w_out = wout_ref[...]                   # (inner, out_dim) bf16

    # Fat projections over the collapsed (bb*n, feat) M axis.  Softmax scale
    # is folded into q once (cheaper than scaling each (n_q, n_k) sim).
    q = jnp.dot(x2, w_q, preferred_element_type=jnp.float32) * scale
    q = q.astype(jnp.bfloat16).reshape(bb, n_q, inner)
    if self_attn:
        ctx2 = x2
    else:
        ctx2 = ctx_ref[...].astype(jnp.bfloat16).reshape(bb * n_k, cd)
    kv = jnp.dot(ctx2, w_kv, preferred_element_type=jnp.float32)
    kv = kv.astype(jnp.bfloat16).reshape(bb, n_k, 2 * inner)

    # Per-head attention (static unroll over small H).  Only the qh/kh/vh
    # slices live in the loop; the output projection is hoisted below.
    # Softmax elementwise math stays in f32.
    head_outs = []
    for h in range(heads):
        lo = h * dim_head
        qh = q[:, :, lo:lo + dim_head]                        # (bb, n_q, Dh)
        kh = kv[:, :, lo:lo + dim_head]                       # (bb, n_k, Dh)
        vh = kv[:, :, inner + lo:inner + lo + dim_head]       # (bb, n_k, Dh)
        sim = jnp.einsum('bid,bjd->bij', qh, kh,
                         preferred_element_type=jnp.float32)  # (bb,n_q,n_k)
        sim = sim - jnp.max(sim, axis=-1, keepdims=True)
        p = jnp.exp(sim)
        l = jnp.sum(p, axis=-1, keepdims=True)                # (bb, n_q, 1)
        oh = jnp.einsum('bij,bjd->bid', p.astype(jnp.bfloat16), vh,
                        preferred_element_type=jnp.float32)   # (bb, n_q, Dh)
        oh = oh * pl.reciprocal(l, approx=True)               # EUP vrcp slot
        head_outs.append(oh.astype(jnp.bfloat16))

    # Merge heads in-register (slab is a few KiB of VMEM/vregs) and do ONE
    # output projection with K=inner instead of H tiny K=Dh matmuls.
    slab = jnp.concatenate(head_outs, axis=-1).reshape(bb * n_q, inner)
    out = jnp.dot(slab, w_out, preferred_element_type=jnp.float32)
    out = out.reshape(bb, n_q, out_dim) + bout_ref[...]       # bias in f32
    o_ref[...] = out.astype(o_ref.dtype)


# ---------------------------------------------------------------------------
# Module wrapper
# ---------------------------------------------------------------------------

def init_params(key, query_dim, image_context_dim, text_context_dim,
                heads, dim_head):
    inner = heads * dim_head
    k1, k2, k3, k4, k5 = jax.random.split(key, 5)
    s = 0.02
    return {
        "heads": heads,
        "dim_head": dim_head,
        "w_q": s * jax.random.normal(k1, (query_dim, inner), jnp.float32),
        "w_kv_image": s * jax.random.normal(
            k2, (image_context_dim, 2 * inner), jnp.float32),
        "w_kv_text": s * jax.random.normal(
            k3, (text_context_dim, 2 * inner), jnp.float32),
        "w_out": s * jax.random.normal(k4, (inner, query_dim), jnp.float32),
        "b_out": s * jax.random.normal(k5, (query_dim,), jnp.float32),
    }


def _pick_batch_block(batch):
    """Fat batch blocks to amortize per-grid-step overhead, while keeping
    >=2 'parallel' grid steps when possible (v7x has 2 TensorCores)."""
    bb = min(batch, 8)
    bb = min(bb, max(1, (batch + 1) // 2))
    while batch % bb:          # avoid ragged last block
        bb -= 1
    return bb


def multimodal_attention(params, x, context=None, modality="image",
                         batch_block=None):
    """Pallas-backed forward matching MultiModalAttention.forward.

    x: (B, Nq, query_dim); context: (B, Nk, ctx_dim) or None (self-attention,
    valid when the selected modality's context dim equals query_dim, as in the
    PyTorch module's `default(context_dim, query_dim)` construction).
    dropout=0.0 (identity).
    """
    # TODO(synk): optional boolean attention-mask path not implemented (mask=None).
    B, n_q, qd = x.shape
    H, Dh = params["heads"], params["dim_head"]
    inner = H * Dh
    scale = Dh ** (-0.5)

    w_kv = params["w_kv_image"] if modality == "image" else params["w_kv_text"]
    self_attn = context is None
    ctx = x if self_attn else context
    n_k, cd = ctx.shape[1], ctx.shape[2]
    assert w_kv.shape[0] == cd, (
        "context feature dim must match the selected modality's kv projection")

    bb = batch_block if batch_block is not None else _pick_batch_block(B)
    assert B % bb == 0
    grid = (B // bb,)

    # bf16 MXU operands (halves weight HBM/VMEM bytes); bias stays f32.
    w_q_b = params["w_q"].astype(jnp.bfloat16)
    w_kv_b = w_kv.astype(jnp.bfloat16)
    w_out_b = params["w_out"].astype(jnp.bfloat16)
    b_out = params["b_out"].reshape(1, qd).astype(jnp.float32)

    kern = functools.partial(_fused_mma_kernel, heads=H, dim_head=Dh,
                             scale=scale, self_attn=self_attn)

    x_spec = pl.BlockSpec((bb, n_q, qd), lambda b: (b, 0, 0))
    ctx_spec = pl.BlockSpec((bb, n_k, cd), lambda b: (b, 0, 0))
    # Grid-invariant operands: constant index_map -> fetched once, resident.
    wq_spec = pl.BlockSpec((qd, inner), lambda b: (0, 0))
    wkv_spec = pl.BlockSpec((cd, 2 * inner), lambda b: (0, 0))
    wout_spec = pl.BlockSpec((inner, qd), lambda b: (0, 0))
    bout_spec = pl.BlockSpec((1, qd), lambda b: (0, 0))
    out_spec = pl.BlockSpec((bb, n_q, qd), lambda b: (b, 0, 0))

    if self_attn:
        operands = (x, w_q_b, w_kv_b, w_out_b, b_out)
        in_specs = [x_spec, wq_spec, wkv_spec, wout_spec, bout_spec]
    else:
        operands = (x, ctx, w_q_b, w_kv_b, w_out_b, b_out)
        in_specs = [x_spec, ctx_spec, wq_spec, wkv_spec, wout_spec, bout_spec]

    return pl.pallas_call(
        kern,
        out_shape=jax.ShapeDtypeStruct((B, n_q, qd), x.dtype),
        grid=grid,
        in_specs=in_specs,
        out_specs=out_spec,
        compiler_params=pltpu.CompilerParams(
            dimension_semantics=("parallel",)),
    )(*operands)


# Pure-JAX reference for verification (f32 throughout).
def reference(params, x, context=None, modality="image"):
    H, Dh = params["heads"], params["dim_head"]
    inner = H * Dh
    scale = Dh ** (-0.5)
    ctx = x if context is None else context
    q = x @ params["w_q"]
    w_kv = params["w_kv_image"] if modality == "image" else params["w_kv_text"]
    kv = ctx @ w_kv
    k, v = kv[..., :inner], kv[..., inner:]

    def sh(t):
        b, n, _ = t.shape
        return t.reshape(b, n, H, Dh).transpose(0, 2, 1, 3).reshape(b * H, n, Dh)

    qh, kh, vh = sh(q), sh(k), sh(v)
    sim = jnp.einsum("bid,bjd->bij", qh, kh) * scale
    attn = jax.nn.softmax(sim, axis=-1)
    oh = jnp.einsum("bij,bjd->bid", attn, vh)
    B, n_q = x.shape[0], x.shape[1]
    out = oh.reshape(B, H, n_q, Dh).transpose(0, 2, 1, 3).reshape(B, n_q, inner)
    return out @ params["w_out"] + params["b_out"]


if __name__ == "__main__":
    key = jax.random.PRNGKey(0)
    kp, kps, kx, kci, kct = jax.random.split(key, 5)

    query_dim, image_ctx_dim, text_ctx_dim = 32, 48, 24
    heads, dim_head = 4, 16
    B, n_q, n_img, n_txt = 2, 8, 10, 6

    params = init_params(kp, query_dim, image_ctx_dim, text_ctx_dim,
                         heads, dim_head)
    # Module built as MultiModalAttention(query_dim, None, None, ...):
    # default(ctx_dim, query_dim) -> kv projections compatible with
    # self-attention (context=None).
    params_self = init_params(kps, query_dim, query_dim, query_dim,
                              heads, dim_head)

    x = jax.random.normal(kx, (B, n_q, query_dim), jnp.float32)
    ctx_image = jax.random.normal(kci, (B, n_img, image_ctx_dim), jnp.float32)
    ctx_text = jax.random.normal(kct, (B, n_txt, text_ctx_dim), jnp.float32)

    out_img = jax.block_until_ready(
        multimodal_attention(params, x, ctx_image, modality="image"))
    out_txt = jax.block_until_ready(
        multimodal_attention(params, x, ctx_text, modality="text"))
    out_self = jax.block_until_ready(
        multimodal_attention(params_self, x, None, modality="image"))

    ref_img = reference(params, x, ctx_image, modality="image")
    ref_txt = reference(params, x, ctx_text, modality="text")
    ref_self = reference(params_self, x, None, modality="image")

    assert out_img.shape == (B, n_q, query_dim)
    assert out_txt.shape == (B, n_q, query_dim)
    assert out_self.shape == (B, n_q, query_dim)
    # bf16 MXU operands + approx reciprocal -> looser tolerance vs f32 ref.
    assert jnp.allclose(out_img, ref_img, atol=2e-2, rtol=2e-2)
    assert jnp.allclose(out_txt, ref_txt, atol=2e-2, rtol=2e-2)
    assert jnp.allclose(out_self, ref_self, atol=2e-2, rtol=2e-2)

    print("KERNEL_OK")
</pallas_src>

<mosaic_0001>
module attributes {stable_mosaic.version = 11 : i64} {
  func.func @_fused_mma_kernel(%arg0: i32, %arg1: memref<1x8x32xf32, #tpu.memory_space<vmem>>, %arg2: memref<1x10x48xf32, #tpu.memory_space<vmem>>, %arg3: memref<32x64xbf16, #tpu.memory_space<vmem>>, %arg4: memref<48x128xbf16, #tpu.memory_space<vmem>>, %arg5: memref<64x32xbf16, #tpu.memory_space<vmem>>, %arg6: memref<1x32xf32, #tpu.memory_space<vmem>>, %arg7: memref<1x8x32xf32, #tpu.memory_space<vmem>>) attributes {dimension_semantics = [#tpu.dimension_semantics<parallel>], iteration_bounds = array<i64: 2>, scalar_prefetch = 0 : i64, scratch_operands = 0 : i64, tpu.core_type = #tpu.core_type<tc>, window_params = [{transform_indices = @transform_0, window_bounds = array<i64: 1, 8, 32>}, {transform_indices = @transform_1, window_bounds = array<i64: 1, 10, 48>}, {pipeline_mode = #tpu.pipeline_mode<synchronous>, transform_indices = @transform_2, window_bounds = array<i64: 32, 64>}, {pipeline_mode = #tpu.pipeline_mode<synchronous>, transform_indices = @transform_3, window_bounds = array<i64: 48, 128>}, {pipeline_mode = #tpu.pipeline_mode<synchronous>, transform_indices = @transform_4, window_bounds = array<i64: 64, 32>}, {pipeline_mode = #tpu.pipeline_mode<synchronous>, transform_indices = @transform_5, window_bounds = array<i64: 1, 32>}, {transform_indices = @transform_6, window_bounds = array<i64: 1, 8, 32>}]} {
    %c0 = arith.constant 0 : index
    %c0_0 = arith.constant 0 : index
    %c0_1 = arith.constant 0 : index
    %0 = vector.load %arg1[%c0, %c0_0, %c0_1] : memref<1x8x32xf32, #tpu.memory_space<vmem>>, vector<1x8x32xf32>
    %1 = arith.truncf %0 : vector<1x8x32xf32> to vector<1x8x32xbf16>
    %2 = vector.shape_cast %1 : vector<1x8x32xbf16> to vector<8x32xbf16>
    %c0_2 = arith.constant 0 : index
    %c0_3 = arith.constant 0 : index
    %3 = vector.load %arg3[%c0_2, %c0_3] : memref<32x64xbf16, #tpu.memory_space<vmem>>, vector<32x64xbf16>
    %c0_4 = arith.constant 0 : index
    %c0_5 = arith.constant 0 : index
    %4 = vector.load %arg4[%c0_4, %c0_5] : memref<48x128xbf16, #tpu.memory_space<vmem>>, vector<48x128xbf16>
    %c0_6 = arith.constant 0 : index
    %c0_7 = arith.constant 0 : index
    %5 = vector.load %arg5[%c0_6, %c0_7] : memref<64x32xbf16, #tpu.memory_space<vmem>>, vector<64x32xbf16>
    %cst = arith.constant dense<0.000000e+00> : vector<8x64xf32>
    %6 = tpu.matmul %2, %3, %cst {dimension_numbers = #tpu.dot_dimension_numbers<[1], [0], [0], [1], [0, 0, 1, 1], [], []>} : vector<8x32xbf16>, vector<32x64xbf16>, vector<8x64xf32> -> vector<8x64xf32>
    %cst_8 = arith.constant 2.500000e-01 : f32
    %7 = vector.broadcast %cst_8 : f32 to vector<8x64xf32>
    %8 = arith.mulf %6, %7 : vector<8x64xf32>
    %9 = arith.truncf %8 : vector<8x64xf32> to vector<8x64xbf16>
    %10 = vector.shape_cast %9 : vector<8x64xbf16> to vector<1x8x64xbf16>
    %c0_9 = arith.constant 0 : index
    %c0_10 = arith.constant 0 : index
    %c0_11 = arith.constant 0 : index
    %11 = vector.load %arg2[%c0_9, %c0_10, %c0_11] : memref<1x10x48xf32, #tpu.memory_space<vmem>>, vector<1x10x48xf32>
    %12 = arith.truncf %11 : vector<1x10x48xf32> to vector<1x10x48xbf16>
    %13 = vector.shape_cast %12 : vector<1x10x48xbf16> to vector<10x48xbf16>
    %cst_12 = arith.constant dense<0.000000e+00> : vector<10x128xf32>
    %14 = tpu.matmul %13, %4, %cst_12 {dimension_numbers = #tpu.dot_dimension_numbers<[1], [0], [0], [1], [0, 0, 1, 1], [], []>} : vector<10x48xbf16>, vector<48x128xbf16>, vector<10x128xf32> -> vector<10x128xf32>
    %15 = arith.truncf %14 : vector<10x128xf32> to vector<10x128xbf16>
    %16 = vector.shape_cast %15 : vector<10x128xbf16> to vector<1x10x128xbf16>
    %17 = vector.extract_strided_slice %10 {offsets = [0, 0, 0], sizes = [1, 8, 16], strides = [1, 1, 1]} : vector<1x8x64xbf16> to vector<1x8x16xbf16>
    %18 = vector.extract_strided_slice %16 {offsets = [0, 0, 0], sizes = [1, 10, 16], strides = [1, 1, 1]} : vector<1x10x128xbf16> to vector<1x10x16xbf16>
    %19 = vector.extract_strided_slice %16 {offsets = [0, 0, 64], sizes = [1, 10, 16], strides = [1, 1, 1]} : vector<1x10x128xbf16> to vector<1x10x16xbf16>
    "tpu.trace_start"() <{level = 10 : i32, message = "bid,bjd->bij"}> : () -> ()
    %cst_13 = arith.constant dense<0.000000e+00> : vector<1x8x10xf32>
    %20 = tpu.matmul %17, %18, %cst_13 {dimension_numbers = #tpu.dot_dimension_numbers<[2], [2], [1], [1], [0, 0, 0, 1, 1, 1], [0], [0]>} : vector<1x8x16xbf16>, vector<1x10x16xbf16>, vector<1x8x10xf32> -> vector<1x8x10xf32>
    "tpu.trace_stop"() : () -> ()
    %cst_14 = arith.constant dense<0xFF800000> : vector<1x8xf32>
    %21 = vector.multi_reduction <maximumf>, %20, %cst_14 [2] : vector<1x8x10xf32> to vector<1x8xf32>
    %22 = vector.shape_cast %21 : vector<1x8xf32> to vector<1x8x1xf32>
    %23 = vector.broadcast %22 : vector<1x8x1xf32> to vector<1x8x10xf32>
    %24 = arith.subf %20, %23 : vector<1x8x10xf32>
    %25 = math.exp %24 : vector<1x8x10xf32>
    %cst_15 = arith.constant dense<0.000000e+00> : vector<1x8xf32>
    %26 = vector.multi_reduction <add>, %25, %cst_15 [2] : vector<1x8x10xf32> to vector<1x8xf32>
    %27 = vector.shape_cast %26 : vector<1x8xf32> to vector<1x8x1xf32>
    %28 = arith.truncf %25 : vector<1x8x10xf32> to vector<1x8x10xbf16>
    "tpu.trace_start"() <{level = 10 : i32, message = "bij,bjd->bid"}> : () -> ()
    %cst_16 = arith.constant dense<0.000000e+00> : vector<1x8x16xf32>
    %29 = tpu.matmul %28, %19, %cst_16 {dimension_numbers = #tpu.dot_dimension_numbers<[2], [1], [1], [2], [0, 0, 0, 1, 1, 2], [0], [0]>} : vector<1x8x10xbf16>, vector<1x10x16xbf16>, vector<1x8x16xf32> -> vector<1x8x16xf32>
    "tpu.trace_stop"() : () -> ()
    %30 = tpu.reciprocal %27 {approx = true} : vector<1x8x1xf32> -> vector<1x8x1xf32>
    %31 = vector.broadcast %30 : vector<1x8x1xf32> to vector<1x8x16xf32>
    %32 = arith.mulf %29, %31 : vector<1x8x16xf32>
    %33 = arith.truncf %32 : vector<1x8x16xf32> to vector<1x8x16xbf16>
    %34 = vector.extract_strided_slice %10 {offsets = [0, 0, 16], sizes = [1, 8, 16], strides = [1, 1, 1]} : vector<1x8x64xbf16> to vector<1x8x16xbf16>
    %35 = vector.extract_strided_slice %16 {offsets = [0, 0, 16], sizes = [1, 10, 16], strides = [1, 1, 1]} : vector<1x10x128xbf16> to vector<1x10x16xbf16>
    %36 = vector.extract_strided_slice %16 {offsets = [0, 0, 80], sizes = [1, 10, 16], strides = [1, 1, 1]} : vector<1x10x128xbf16> to vector<1x10x16xbf16>
    "tpu.trace_start"() <{level = 10 : i32, message = "bid,bjd->bij"}> : () -> ()
    %cst_17 = arith.constant dense<0.000000e+00> : vector<1x8x10xf32>
    %37 = tpu.matmul %34, %35, %cst_17 {dimension_numbers = #tpu.dot_dimension_numbers<[2], [2], [1], [1], [0, 0, 0, 1, 1, 1], [0], [0]>} : vector<1x8x16xbf16>, vector<1x10x16xbf16>, vector<1x8x10xf32> -> vector<1x8x10xf32>
    "tpu.trace_stop"() : () -> ()
    %cst_18 = arith.constant dense<0xFF800000> : vector<1x8xf32>
    %38 = vector.multi_reduction <maximumf>, %37, %cst_18 [2] : vector<1x8x10xf32> to vector<1x8xf32>
    %39 = vector.shape_cast %38 : vector<1x8xf32> to vector<1x8x1xf32>
    %40 = vector.broadcast %39 : vector<1x8x1xf32> to vector<1x8x10xf32>
    %41 = arith.subf %37, %40 : vector<1x8x10xf32>
    %42 = math.exp %41 : vector<1x8x10xf32>
    %cst_19 = arith.constant dense<0.000000e+00> : vector<1x8xf32>
    %43 = vector.multi_reduction <add>, %42, %cst_19 [2] : vector<1x8x10xf32> to vector<1x8xf32>
    %44 = vector.shape_cast %43 : vector<1x8xf32> to vector<1x8x1xf32>
    %45 = arith.truncf %42 : vector<1x8x10xf32> to vector<1x8x10xbf16>
    "tpu.trace_start"() <{level = 10 : i32, message = "bij,bjd->bid"}> : () -> ()
    %cst_20 = arith.constant dense<0.000000e+00> : vector<1x8x16xf32>
    %46 = tpu.matmul %45, %36, %cst_20 {dimension_numbers = #tpu.dot_dimension_numbers<[2], [1], [1], [2], [0, 0, 0, 1, 1, 2], [0], [0]>} : vector<1x8x10xbf16>, vector<1x10x16xbf16>, vector<1x8x16xf32> -> vector<1x8x16xf32>
    "tpu.trace_stop"() : () -> ()
    %47 = tpu.reciprocal %44 {approx = true} : vector<1x8x1xf32> -> vector<1x8x1xf32>
    %48 = vector.broadcast %47 : vector<1x8x1xf32> to vector<1x8x16xf32>
    %49 = arith.mulf %46, %48 : vector<1x8x16xf32>
    %50 = arith.truncf %49 : vector<1x8x16xf32> to vector<1x8x16xbf16>
    %51 = vector.extract_strided_slice %10 {offsets = [0, 0, 32], sizes = [1, 8, 16], strides = [1, 1, 1]} : vector<1x8x64xbf16> to vector<1x8x16xbf16>
    %52 = vector.extract_strided_slice %16 {offsets = [0, 0, 32], sizes = [1, 10, 16], strides = [1, 1, 1]} : vector<1x10x128xbf16> to vector<1x10x16xbf16>
    %53 = vector.extract_strided_slice %16 {offsets = [0, 0, 96], sizes = [1, 10, 16], strides = [1, 1, 1]} : vector<1x10x128xbf16> to vector<1x10x16xbf16>
    "tpu.trace_start"() <{level = 10 : i32, message = "bid,bjd->bij"}> : () -> ()
    %cst_21 = arith.constant dense<0.000000e+00> : vector<1x8x10xf32>
    %54 = tpu.matmul %51, %52, %cst_21 {dimension_numbers = #tpu.dot_dimension_numbers<[2], [2], [1], [1], [0, 0, 0, 1, 1, 1], [0], [0]>} : vector<1x8x16xbf16>, vector<1x10x16xbf16>, vector<1x8x10xf32> -> vector<1x8x10xf32>
    "tpu.trace_stop"() : () -> ()
    %cst_22 = arith.constant dense<0xFF800000> : vector<1x8xf32>
    %55 = vector.multi_reduction <maximumf>, %54, %cst_22 [2] : vector<1x8x10xf32> to vector<1x8xf32>
    %56 = vector.shape_cast %55 : vector<1x8xf32> to vector<1x8x1xf32>
    %57 = vector.broadcast %56 : vector<1x8x1xf32> to vector<1x8x10xf32>
    %58 = arith.subf %54, %57 : vector<1x8x10xf32>
    %59 = math.exp %58 : vector<1x8x10xf32>
    %cst_23 = arith.constant dense<0.000000e+00> : vector<1x8xf32>
    %60 = vector.multi_reduction <add>, %59, %cst_23 [2] : vector<1x8x10xf32> to vector<1x8xf32>
    %61 = vector.shape_cast %60 : vector<1x8xf32> to vector<1x8x1xf32>
    %62 = arith.truncf %59 : vector<1x8x10xf32> to vector<1x8x10xbf16>
    "tpu.trace_start"() <{level = 10 : i32, message = "bij,bjd->bid"}> : () -> ()
    %cst_24 = arith.constant dense<0.000000e+00> : vector<1x8x16xf32>
    %63 = tpu.matmul %62, %53, %cst_24 {dimension_numbers = #tpu.dot_dimension_numbers<[2], [1], [1], [2], [0, 0, 0, 1, 1, 2], [0], [0]>} : vector<1x8x10xbf16>, vector<1x10x16xbf16>, vector<1x8x16xf32> -> vector<1x8x16xf32>
    "tpu.trace_stop"() : () -> ()
    %64 = tpu.reciprocal %61 {approx = true} : vector<1x8x1xf32> -> vector<1x8x1xf32>
    %65 = vector.broadcast %64 : vector<1x8x1xf32> to vector<1x8x16xf32>
    %66 = arith.mulf %63, %65 : vector<1x8x16xf32>
    %67 = arith.truncf %66 : vector<1x8x16xf32> to vector<1x8x16xbf16>
    %68 = vector.extract_strided_slice %10 {offsets = [0, 0, 48], sizes = [1, 8, 16], strides = [1, 1, 1]} : vector<1x8x64xbf16> to vector<1x8x16xbf16>
    %69 = vector.extract_strided_slice %16 {offsets = [0, 0, 48], sizes = [1, 10, 16], strides = [1, 1, 1]} : vector<1x10x128xbf16> to vector<1x10x16xbf16>
    %70 = vector.extract_strided_slice %16 {offsets = [0, 0, 112], sizes = [1, 10, 16], strides = [1, 1, 1]} : vector<1x10x128xbf16> to vector<1x10x16xbf16>
    "tpu.trace_start"() <{level = 10 : i32, message = "bid,bjd->bij"}> : () -> ()
    %cst_25 = arith.constant dense<0.000000e+00> : vector<1x8x10xf32>
    %71 = tpu.matmul %68, %69, %cst_25 {dimension_numbers = #tpu.dot_dimension_numbers<[2], [2], [1], [1], [0, 0, 0, 1, 1, 1], [0], [0]>} : vector<1x8x16xbf16>, vector<1x10x16xbf16>, vector<1x8x10xf32> -> vector<1x8x10xf32>
    "tpu.trace_stop"() : () -> ()
    %cst_26 = arith.constant dense<0xFF800000> : vector<1x8xf32>
    %72 = vector.multi_reduction <maximumf>, %71, %cst_26 [2] : vector<1x8x10xf32> to vector<1x8xf32>
    %73 = vector.shape_cast %72 : vector<1x8xf32> to vector<1x8x1xf32>
    %74 = vector.broadcast %73 : vector<1x8x1xf32> to vector<1x8x10xf32>
    %75 = arith.subf %71, %74 : vector<1x8x10xf32>
    %76 = math.exp %75 : vector<1x8x10xf32>
    %cst_27 = arith.constant dense<0.000000e+00> : vector<1x8xf32>
    %77 = vector.multi_reduction <add>, %76, %cst_27 [2] : vector<1x8x10xf32> to vector<1x8xf32>
    %78 = vector.shape_cast %77 : vector<1x8xf32> to vector<1x8x1xf32>
    %79 = arith.truncf %76 : vector<1x8x10xf32> to vector<1x8x10xbf16>
    "tpu.trace_start"() <{level = 10 : i32, message = "bij,bjd->bid"}> : () -> ()
    %cst_28 = arith.constant dense<0.000000e+00> : vector<1x8x16xf32>
    %80 = tpu.matmul %79, %70, %cst_28 {dimension_numbers = #tpu.dot_dimension_numbers<[2], [1], [1], [2], [0, 0, 0, 1, 1, 2], [0], [0]>} : vector<1x8x10xbf16>, vector<1x10x16xbf16>, vector<1x8x16xf32> -> vector<1x8x16xf32>
    "tpu.trace_stop"() : () -> ()
    %81 = tpu.reciprocal %78 {approx = true} : vector<1x8x1xf32> -> vector<1x8x1xf32>
    %82 = vector.broadcast %81 : vector<1x8x1xf32> to vector<1x8x16xf32>
    %83 = arith.mulf %80, %82 : vector<1x8x16xf32>
    %84 = arith.truncf %83 : vector<1x8x16xf32> to vector<1x8x16xbf16>
    %85 = tpu.concatenate %33, %50, %67, %84 in 2 : vector<1x8x16xbf16>, vector<1x8x16xbf16>, vector<1x8x16xbf16>, vector<1x8x16xbf16> -> vector<1x8x64xbf16>
    %86 = vector.shape_cast %85 : vector<1x8x64xbf16> to vector<8x64xbf16>
    %cst_29 = arith.constant dense<0.000000e+00> : vector<8x32xf32>
    %87 = tpu.matmul %86, %5, %cst_29 {dimension_numbers = #tpu.dot_dimension_numbers<[1], [0], [0], [1], [0, 0, 1, 1], [], []>} : vector<8x64xbf16>, vector<64x32xbf16>, vector<8x32xf32> -> vector<8x32xf32>
    %88 = vector.shape_cast %87 : vector<8x32xf32> to vector<1x8x32xf32>
    %c0_30 = arith.constant 0 : index
    %c0_31 = arith.constant 0 : index
    %89 = vector.load %arg6[%c0_30, %c0_31] : memref<1x32xf32, #tpu.memory_space<vmem>>, vector<1x32xf32>
    %90 = vector.shape_cast %89 : vector<1x32xf32> to vector<1x1x32xf32>
    %91 = vector.broadcast %90 : vector<1x1x32xf32> to vector<1x8x32xf32>
    %92 = arith.addf %88, %91 : vector<1x8x32xf32>
    %c0_32 = arith.constant 0 : index
    %c0_33 = arith.constant 0 : index
    %c0_34 = arith.constant 0 : index
    %93 = vector.load %arg7[%c0_32, %c0_33, %c0_34] : memref<1x8x32xf32, #tpu.memory_space<vmem>>, vector<1x8x32xf32>
    tpu.vector_store %arg7[%c0_32, %c0_33, %c0_34], %92 {strides = array<i32>} : memref<1x8x32xf32, #tpu.memory_space<vmem>>, vector<1x8x32xf32>,
    return
  }
  func.func @transform_0(%arg0: i32) -> (i32, i32, i32) {
    %c0_i32 = arith.constant 0 : i32
    %c0_i32_0 = arith.constant 0 : i32
    %c0_i32_1 = arith.constant 0 : i32
    return %arg0, %c0_i32, %c0_i32_0 : i32, i32, i32
  }
  func.func @transform_1(%arg0: i32) -> (i32, i32, i32) {
    %c0_i32 = arith.constant 0 : i32
    %c0_i32_0 = arith.constant 0 : i32
    %c0_i32_1 = arith.constant 0 : i32
    return %arg0, %c0_i32, %c0_i32_0 : i32, i32, i32
  }
  func.func @transform_2(%arg0: i32) -> (i32, i32) {
    %c0_i32 = arith.constant 0 : i32
    %c0_i32_0 = arith.constant 0 : i32
    %c0_i32_1 = arith.constant 0 : i32
    return %c0_i32, %c0_i32_0 : i32, i32
  }
  func.func @transform_3(%arg0: i32) -> (i32, i32) {
    %c0_i32 = arith.constant 0 : i32
    %c0_i32_0 = arith.constant 0 : i32
    %c0_i32_1 = arith.constant 0 : i32
    return %c0_i32, %c0_i32_0 : i32, i32
  }
  func.func @transform_4(%arg0: i32) -> (i32, i32) {
    %c0_i32 = arith.constant 0 : i32
    %c0_i32_0 = arith.constant 0 : i32
    %c0_i32_1 = arith.constant 0 : i32
    return %c0_i32, %c0_i32_0 : i32, i32
  }
  func.func @transform_5(%arg0: i32) -> (i32, i32) {
    %c0_i32 = arith.constant 0 : i32
    %c0_i32_0 = arith.constant 0 : i32
    %c0_i32_1 = arith.constant 0 : i32
    return %c0_i32, %c0_i32_0 : i32, i32
  }
  func.func @transform_6(%arg0: i32) -> (i32, i32, i32) {
    %c0_i32 = arith.constant 0 : i32
    %c0_i32_0 = arith.constant 0 : i32
    %c0_i32_1 = arith.constant 0 : i32
    return %arg0, %c0_i32, %c0_i32_0 : i32, i32, i32
  }
}

</mosaic_0001>

<bundles_post_ra>
// kernel: tpu_custom_call.1
= control target key start
LH: loop header
LB: loop body
LE: loop exit
PB: predicated region body
PF: predicated region fallthrough
CT: control target
= control target key end

     0   :  { %11 = vsyncpa [#allocation3], 0  ;;  %s1575_s0 = inlined_call_operand.vmem [shape: f32[2,8,32], index: 0, kind: input, shape index: {}]   ;;  %s1576_s1 = inlined_call_operand.vmem [shape: f32[2,10,48], index: 1, kind: input, shape index: {}]   ;;  %s1577_s2 = inlined_call_operand.vmem [shape: bf16[32,64], index: 2, kind: input, shape index: {}]   ;;  %s1578_s3 = inlined_call_operand.vmem [shape: bf16[48,128], index: 3, kind: input, shape index: {}]   ;;  %s1579_s4 = inlined_call_operand.vmem [shape: bf16[64,32], index: 4, kind: input, shape index: {}]   ;;  %s1580_s5 = inlined_call_operand.vmem [shape: f32[1,32], index: 5, kind: input, shape index: {}]   ;;  %s1581_s6 = inlined_call_operand.hbm [shape: f32[2,8,32], index: 6, kind: output, shape index: {}]  }
   0x1   :  { %13 = vsyncpa [#allocation3 + $0x1], 0  ;;  %s1357_s21 = smov 0   ;;  %s1359_s22 = smov 0  }
   0x2   :  { %s1361_s23 = smov 0   ;;  %s1363_s24 = smov 0  }
   0x3 LB: > { %s1378_s25 = sadd.s32 4294967295, %s1310_s24   ;;  %s1035_s26 = sadd.s32 4294967294, %s1310_s24   ;;  %s1310_s24 = sphi %s1363_s24, %s1587_s24   ;;  %s1306_s23 = sphi %s1361_s23, %s1586_s23   ;;  %s1302_s22 = sphi %s1359_s22, %s1585_s22   ;;  %s1298_s21 = sphi %s1357_s21, %s1584_s21  }
   0x4   : > { %s1382_s27 = sadd.s32 1, %s1310_s24   ;;  %s162_s28 = sadd.s32 1, %s1306_s23 }
   0x5   : > { %s159_s29 = ssub.s32 %s1310_s24, %s1382_s27  ;;  %p172_p0 = scmp.ne.s32.totalorder %s1306_s23, %s1302_s22 }
   0x6   : > { %p160_p1 = scmp.eq.s32.totalorder %s159_s29, 0  ;;  %p173_p2 = scmp.eq.s32.totalorder %s1378_s25, 1 }
   0x7   : > { %p178_p3 = scmp.ne.s32.totalorder %s1302_s22, %s1298_s21  ;;  %p179_p4 = scmp.eq.s32.totalorder %s1035_s26, 1 }
   0x8   : > { %s1393_s30 = scalar_select %p160_p1, %s1306_s23, %s162_s28  }
   0x9   : > { %p1395_p5 = por %p173_p2, %p172_p0  ;;  %p1399_p6 = por %p179_p4, %p178_p3 }
   0xa   : > { %p1038_p7 = scmp.ge.s32.totalorder %s1310_s24, 1  ;;  %p224_p8 = scmp.lt.s32.totalorder %s1310_s24, 3 }
   0xc   : > { %p225_p9 = pnand %p1038_p7, %p224_p8 }
   0xd   : > { %v1223_v0 = vld [vmem:[%s1577_s2] sm:$0xff] (!%p225_p9)   ;;  %v1312_v1 = vmov (!%p225_p9), 0.0   ;;  %v1224_v2 = vld [vmem:[%s1577_s2 + $0x8] sm:$0xff] (!%p225_p9)   ;;  %vm1313_vm0 = vmmov (!%p225_p9), 0   ;;  %p258_p10 = scmp.lt.s32.totalorder (!%p225_p9), %s1378_s25, 1  ;;  %vm300_vm1 = vcmask (!%p225_p9), 261120  }
   0xe   : > { %228 = sbr.rel (%p225_p9) target bundleno = 1334 (0x536), region = 44  ;;  %1097 = vmatprep.subr.bf16.mxu1 (!%p225_p9), %v1312_v1  ;;  %1115 = vmatprep.subr.bf16.mxu0 (!%p225_p9), %v1312_v1  ;;  %v1225_v4 = vld [vmem:[%s1578_s3] sm:$0xff] (!%p225_p9)   ;;  %v1226_v6 = vld [vmem:[%s1578_s3 + $0x8] sm:$0xff] (!%p225_p9)   ;;  %v1227_v7 = vld [vmem:[%s1578_s3 + $0x10] sm:$0xff] (!%p225_p9)   ;;  %vm367_vm2 = vcmask (!%p225_p9), 392192   ;;  %vm413_vm3 = vcmask (!%p225_p9), 130048  }
   0xf   : > { %1098 = vmatpush3.bf16.msra.mxu1 (!%p225_p9), %v1223_v0  ;;  %1101 = vmatprep.mubr.msk.bf16.mxu1 (!%p225_p9), %vm1313_vm0, %v1312_v1  ;;  %s1316_s15 = smov (!%p225_p9), 80   ;;  %s1317_s16 = smov (!%p225_p9), 64   ;;  %vm477_vm4 = vcmask (!%p225_p9), 1044480   ;;  %vm460_vm5 = vcmask (!%p225_p9), 80896   ;;  %vm898_vm6 = vcmask (!%p225_p9), 523264  }
  0x10   : > { %1099 = vmatprep.subr.bf16.mxu1 (!%p225_p9), %v1312_v1  ;;  %1117 = vmatprep.mubr.msk.bf16.mxu0 (!%p225_p9), %vm1313_vm0, %v1312_v1  ;;  %s1319_s18 = smov (!%p225_p9), 16   ;;  %s1320_s19 = smov (!%p225_p9), 48  }
  0x11   : > { %s1321_s9 = smov (!%p225_p9), [#allocation2]  }
  0x13   : > { %1100 = vmatpush3.bf16.msra.mxu1 (!%p225_p9), %v1224_v2 }
  0x14   : > { %1105 = vmatprep.subr.bf16.mxu1 (!%p225_p9), %v1312_v1 }
  0x15   : > { %s259_s13 = scalar_select %p258_p10, %s1378_s25, 1 }
  0x17   : > { %s1040_s14 = sshll.u32 %s259_s13, 3  ;;  %s1068_s20 = sshll.u32 %s259_s13, 4 }
  0x18   : > { %s261_s17 = scalar_lea.vmem %s1575_s0, %s1040_s14  ;;  %s266_s10 = scalar_lea.vmem %s1576_s1, %s1068_s20 }
  0x19   : > { %v268_v3 = vld [vmem:[%s261_s17] sm:$0xff]  ;;  %v347_v9 = vld [vmem:[%s266_s10 + $0x8] sm:$0x3]  ;;  %s1314_s13 = smov 96   ;;  %s1315_s14 = smov 112  }
  0x1a   : > { %v269_v5 = vpack.c.bf16 %v268_v3, %v268_v3  ;;  %v346_v8 = vld [vmem:[%s266_s10] sm:$0xff]  ;;  %s1318_s17 = smov 32   ;;  %s1252_s10 = sshll.u32 %s1321_s9, 4  ;;  %s1253_s10 = int_to_ptr.vmem [resolvable:$false] %s1252_s10 }
  0x1b   : > { %v348_v10 = vpack.c.bf16 %v347_v9, %v346_v8  ;;  %s1254_s11 = scalar_lea.vmem %s1253_s10, 256 }
  0x1c   : > { %1102 = vmatmul.mubr.msk.bf16.vlgmr.msra.gmra.mrb[0].mxu1 %vm300_vm1, %v269_v5 }
  0x1d   : > { %1106 = vmatpush3.bf16.msra.mxu1 %v1225_v4  ;;  %1111 = vmatprep.mubr.msk.bf16.mxu1 %vm1313_vm0, %v1312_v1 }
  0x1e   : > { %1107 = vmatprep.subr.bf16.mxu1 %v1312_v1 }
  0x21   : > { %1108 = vmatpush3.bf16.msra.mxu1 %v1226_v6 }
  0x22   : > { %1109 = vmatprep.subr.bf16.mxu1 %v1312_v1 }
  0x25   : > { %1110 = vmatpush3.bf16.msra.mxu1 %v1227_v7 }
  0x26   : > { %1121 = vmatprep.subr.bf16.mxu1 %v1312_v1 }
  0x28   : > { %1112 = vmatmul.mubr.msk.bf16.vlgmr.msra.gmra.mrb[4].mxu1 %vm367_vm2, %v348_v10 }
  0x29   : > { %1123 = vmatprep.mubr.msk.bf16.mxu1 %vm1313_vm0, %v1312_v1 }
  0xef   : > { %v338_v11 = vpop.f32.mrb[0].mxu1 }
  0xf0   : > { %v1103_v12 = vpop.f32.mrb[1].mxu1  ;;  %v344_v18 = vmul.f32 0.25, %v338_v11 }
  0xf1   : > { %v341_v13 = vpop.f32.mrb[2].mxu1 }
  0xf2   : > { %v1104_v14 = vpop.f32.mrb[3].mxu1  ;;  %v345_v22 = vpack.c.bf16 %v344_v18, %v344_v18 }
  0xfb   : > { %v405_v15 = vpop.f32.mrb[4].mxu1 }
  0xfc   : > { %v1113_v16 = vpop.f32.mrb[5].mxu1 }
  0xfd   : > { %v408_v17 = vpop.f32.mrb[6].mxu1 }
  0xfe   : > { %v1445_v19 = vpack.c.bf16 %v408_v17, %v405_v15  ;;  %v1114_v20 = vpop.f32.mrb[7].mxu1 }
 0x100   : > { %638 = vrot.lane.b32.xlu1 %v1445_v19, %s1314_s13  ;;  %527 = vrot.lane.b32.xlu0 %v1445_v19, %s1315_s14  ;;  %v418_v21 = vsel %vm413_vm3, %v1445_v19, 0 }
 0x101   : > { %1116 = vmatpush3.bf16.xpose.msra.mxu0 %v418_v21 }
 0x102   : > { %1127 = vmatprep.subr.bf16.mxu0 %v1312_v1 }
 0x104   : > { %636 = vrot.lane.b32.xlu1 %v345_v22, %s1314_s13  ;;  %525 = vrot.lane.b32.xlu0 %v345_v22, %s1315_s14  ;;  %s255_s13 = sand.u32 1, %s1302_s22  }
 0x105   : > { %s1039_s14 = sshll.u32 %s255_s13, 3 }
 0x108   : > { %747 = vrot.lane.b32.xlu1 %v345_v22, %s1316_s15  ;;  %749 = vrot.lane.b32.xlu0 %v1445_v19, %s1316_s15 }
 0x109   : > { %1118 = vmatmul.mubr.msk.bf16.vlgmr.msra.gmra.mrb[0].mxu0 %vm413_vm3, %v345_v22 }
 0x10a   : > { %1129 = vmatprep.mubr.msk.bf16.mxu0 %vm1313_vm0, %v1312_v1 }
 0x10c   : > { %472 = vrot.lane.b32.xlu1 %v1445_v19, %s1317_s16 }
 0x172   : > { %v639_v23 = vpop.permute.xlu1 %638  ;;  %v528_v24 = vpop.permute.xlu0 %527 }
 0x173   : > { %v533_v25 = vsel %vm413_vm3, %v528_v24, 0  ;;  %v644_v29 = vsel %vm413_vm3, %v639_v23, 0 }
 0x174   : > { %1128 = vmatpush3.bf16.xpose.msra.mxu0 %v533_v25 }
 0x175   : > { %1139 = vmatprep.subr.bf16.mxu0 %v1312_v1 }
 0x176   : > { %v637_v26 = vpop.permute.xlu1 %636  ;;  %v526_v27 = vpop.permute.xlu0 %525 }
 0x17a   : > { %v748_v28 = vpop.permute.xlu1 %747  ;;  %v750_v32 = vpop.permute.xlu0 %749 }
 0x17b   : > { %1130 = vmatmul.mubr.msk.bf16.vlgmr.msra.gmra.mrb[4].mxu0 %vm413_vm3, %v526_v27  ;;  %v755_v33 = vsel %vm413_vm3, %v750_v32, 0  ;;  %v1229_v27 = vld [vmem:[%s1579_s4 + $0x8] sm:$0xff]  }
 0x17c   : > { %1140 = vmatpush3.bf16.xpose.msra.mxu0 %v644_v29  ;;  %1141 = vmatprep.mubr.msk.bf16.mxu0 %vm1313_vm0, %v1312_v1 }
 0x17d   : > { %1151 = vmatprep.subr.bf16.mxu0 %v1312_v1 }
 0x17e   : > { %v473_v30 = vpop.permute.xlu1 %472 }
 0x17f   : > { %v479_v31 = vsel %vm477_vm4, %v473_v30, 0 }
 0x180   : > { %1122 = vmatpush3.bf16.msra.mxu1 %v479_v31  ;;  %v1230_v31 = vld [vmem:[%s1579_s4 + $0x10] sm:$0xff]  }
 0x181   : > { %1133 = vmatprep.subr.bf16.mxu1 %v1312_v1 }
 0x183   : > { %1142 = vmatmul.mubr.msk.bf16.vlgmr.msra.gmra.mrb[8].mxu0 %vm413_vm3, %v637_v26  ;;  %v1228_v26 = vld [vmem:[%s1579_s4] sm:$0xff]  }
 0x184   : > { %1152 = vmatpush3.bf16.xpose.msra.mxu0 %v755_v33  ;;  %1153 = vmatprep.mubr.msk.bf16.mxu0 %vm1313_vm0, %v1312_v1 }
 0x185   : > { %1163 = vmatprep.subr.bf16.mxu0 %v1312_v1 }
 0x18b   : > { %1154 = vmatmul.mubr.msk.bf16.vlgmr.msra.gmra.mrb[12].mxu0 %vm413_vm3, %v748_v28 }
 0x18c   : > { %1171 = vmatprep.mubr.msk.bf16.mxu0 %vm1313_vm0, %v1312_v1  ;;  %1164 = vmatpush3.bf16.msra.mxu0 %v1228_v26 }
 0x18d   : > { %1165 = vmatprep.subr.bf16.mxu0 %v1312_v1 }
 0x190   : > { %1166 = vmatpush3.bf16.msra.mxu0 %v1229_v27 }
 0x191   : > { %1167 = vmatprep.subr.bf16.mxu0 %v1312_v1 }
 0x194   : > { %1168 = vmatpush3.bf16.msra.mxu0 %v1230_v31 }
 0x195   : > { %1169 = vmatprep.subr.bf16.mxu0 %v1312_v1 }
 0x1dc   : > { %v454_v34 = vpop.f32.mrb[0].mxu0 }
 0x1dd   : > { %v1119_v35 = vpop.f32.mrb[1].mxu0  ;;  %v461_v36 = vsel %vm460_vm5, %v454_v34, -inf }
 0x1de   : > { %462 = vmax.xlane.f32.xlu0 %v461_v36  ;;  %v457_v37 = vpop.f32.mrb[2].mxu0  ;;  %v1231_v35 = vld [vmem:[%s1579_s4 + $0x18] sm:$0xff]  }
 0x1df   : > { %v1120_v38 = vpop.f32.mrb[3].mxu0  ;;  %1170 = vmatpush3.bf16.msra.mxu0 %v1231_v35 }
 0x24e   : > { %v569_v39 = vpop.f32.mrb[4].mxu0 }
 0x24f   : > { %v1131_v40 = vpop.f32.mrb[5].mxu0  ;;  %v575_v41 = vsel %vm460_vm5, %v569_v39, -inf }
 0x250   : > { %576 = vmax.xlane.f32.xlu1 %v575_v41  ;;  %v572_v42 = vpop.f32.mrb[6].mxu0 }
 0x251   : > { %v1132_v43 = vpop.f32.mrb[7].mxu0 }
 0x256   : > { %v680_v44 = vpop.f32.mrb[8].mxu0 }
 0x257   : > { %v1143_v45 = vpop.f32.mrb[9].mxu0  ;;  %v686_v46 = vsel %vm460_vm5, %v680_v44, -inf }
 0x258   : > { %687 = vmax.xlane.f32.xlu0 %v686_v46  ;;  %v683_v47 = vpop.f32.mrb[10].mxu0 }
 0x259   : > { %v1144_v48 = vpop.f32.mrb[11].mxu0 }
 0x25e   : > { %v791_v49 = vpop.f32.mrb[12].mxu0 }
 0x25f   : > { %v1155_v50 = vpop.f32.mrb[13].mxu0  ;;  %v797_v51 = vsel %vm460_vm5, %v791_v49, -inf }
 0x260   : > { %798 = vmax.xlane.f32.xlu0 %v797_v51  ;;  %v794_v52 = vpop.f32.mrb[14].mxu0 }
 0x261   : > { %696 = vrot.lane.b32.xlu1 %v1445_v19, %s1318_s17  ;;  %v1156_v53 = vpop.f32.mrb[15].mxu0 }
 0x265   : > { %807 = vrot.lane.b32.xlu1 %v1445_v19, %s1319_s18 }
 0x26b   : > { %v463_v54 = vpop.xlane.xlu0 %462 }
 0x26c   : > { %v464_v55 = vsub.f32 %v454_v34, %v463_v54 }
 0x26e   : > { %v465_v56 = vmul.f32 1.442695, %v464_v55 }
 0x270   : > { %1232 = vpow2.f32 %v465_v56 }
 0x276   : > { %585 = vrot.lane.b32.xlu0 %v1445_v19, %s1320_s19 }
 0x27a   : > { %v1233_v57 = vpop.eup %1232 }
 0x27b   : > { %v470_v58 = vpack.c.bf16 %v1233_v57, %v1233_v57  ;;  %v467_v19 = vsel %vm460_vm5, %v1233_v57, 0.0 }
 0x27d   : > { %1124 = vmatmul.mubr.msk.bf16.vlgmr.msra.gmra.mrb[8].mxu1 %vm460_vm5, %v470_v58 }
 0x27e   : > { %1135 = vmatprep.mubr.msk.bf16.mxu1 %vm1313_vm0, %v1312_v1 }
 0x2dd   : > { %v577_v59 = vpop.xlane.xlu1 %576 }
 0x2de   : > { %v578_v60 = vsub.f32 %v569_v39, %v577_v59 }
 0x2e0   : > { %v579_v61 = vmul.f32 1.442695, %v578_v60 }
 0x2e1   : > { %v697_v9 = vpop.permute.xlu1 %696 }
 0x2e2   : > { %1234 = vpow2.f32 %v579_v61  ;;  %v702_v13 = vsel %vm477_vm4, %v697_v9, 0 }
 0x2e5   : > { %v688_v62 = vpop.xlane.xlu0 %687  ;;  %v808_v14 = vpop.permute.xlu1 %807 }
 0x2e6   : > { %v689_v63 = vsub.f32 %v680_v44, %v688_v62  ;;  %v813_v18 = vsel %vm477_vm4, %v808_v14, 0  ;;  %v1063_v62 = vld [vmem:[%s1580_s5] ss:$0 sm:$0xff] }
 0x2e8   : > { %v690_v0 = vmul.f32 1.442695, %v689_v63 }
 0x2ea   : > { %1236 = vpow2.f32 %v690_v0 }
 0x2ec   : > { %v1235_v2 = vpop.eup %1234 }
 0x2ed   : > { %v799_v3 = vpop.xlane.xlu0 %798  ;;  %v581_v4 = vsel %vm460_vm5, %v1235_v2, 0.0  ;;  %v584_v11 = vpack.c.bf16 %v1235_v2, %v1235_v2 }
 0x2ee   : > { %v800_v5 = vsub.f32 %v791_v49, %v799_v3  ;;  %582 = vadd.xlane.f32.xlu0 %v581_v4 }
 0x2f0   : > { %v801_v6 = vmul.f32 1.442695, %v800_v5 }
 0x2f1   : > { %v586_v7 = vpop.permute.xlu0 %585 }
 0x2f2   : > { %1238 = vpow2.f32 %v801_v6  ;;  %v591_v8 = vsel %vm477_vm4, %v586_v7, 0 }
 0x2f3   : > { %1134 = vmatpush3.bf16.msra.mxu1 %v591_v8 }
 0x2f4   : > { %v1237_v10 = vpop.eup %1236  ;;  %1145 = vmatprep.subr.bf16.mxu1 %v1312_v1 }
 0x2f5   : > { %v692_v12 = vsel %vm460_vm5, %v1237_v10, 0.0  ;;  %v695_v16 = vpack.c.bf16 %v1237_v10, %v1237_v10 }
 0x2f6   : > { %693 = vadd.xlane.f32.xlu1 %v692_v12  ;;  %1136 = vmatmul.mubr.msk.bf16.vlgmr.msra.gmra.mrb[12].mxu1 %vm460_vm5, %v584_v11 }
 0x2f7   : > { %1146 = vmatpush3.bf16.msra.mxu1 %v702_v13  ;;  %1147 = vmatprep.mubr.msk.bf16.mxu1 %vm1313_vm0, %v1312_v1 }
 0x2f8   : > { %1157 = vmatprep.subr.bf16.mxu1 %v1312_v1 }
 0x2fc   : > { %v1239_v15 = vpop.eup %1238 }
 0x2fd   : > { %v803_v17 = vsel %vm460_vm5, %v1239_v15, 0.0  ;;  %v806_v20 = vpack.c.bf16 %v1239_v15, %v1239_v15 }
 0x2fe   : > { %804 = vadd.xlane.f32.xlu0 %v803_v17  ;;  %1148 = vmatmul.mubr.msk.bf16.vlgmr.msra.gmra.mrb[16].mxu1 %vm460_vm5, %v695_v16 }
 0x2ff   : > { %1158 = vmatpush3.bf16.msra.mxu1 %v813_v18  ;;  %1159 = vmatprep.mubr.msk.bf16.mxu1 %vm1313_vm0, %v1312_v1 }
 0x302   : > { %468 = vadd.xlane.f32.xlu0 %v467_v19 }
 0x306   : > { %1160 = vmatmul.mubr.msk.bf16.vlgmr.msra.gmra.mrb[20].mxu1 %vm460_vm5, %v806_v20 }
 0x350   : > { %v515_v21 = vpop.f32.mrb[8].mxu1 }
 0x351   : > { %v1125_v22 = vpop.f32.mrb[9].mxu1 }
 0x352   : > { %v518_v23 = vpop.f32.mrb[10].mxu1 }
 0x353   : > { %v1126_v24 = vpop.f32.mrb[11].mxu1 }
 0x37b   : > { %v583_v25 = vpop.xlane.xlu0 %582 }
 0x37c   : > { %1240 = vrcp.f32 %v583_v25 }
 0x383   : > { %v694_v28 = vpop.xlane.xlu1 %693 }
 0x384   : > { %1242 = vrcp.f32 %v694_v28 }
 0x386   : > { %v1241_v29 = vpop.eup %1240 }
 0x38b   : > { %v805_v36 = vpop.xlane.xlu0 %804 }
 0x38c   : > { %1244 = vrcp.f32 %v805_v36 }
 0x38e   : > { %v1243_v39 = vpop.eup %1242 }
 0x38f   : > { %v469_v52 = vpop.xlane.xlu0 %468 }
 0x390   : > { %1246 = vrcp.f32 %v469_v52 }
 0x396   : > { %v1245_v46 = vpop.eup %1244 }
 0x39a   : > { %v1247_v53 = vpop.eup %1246 }
 0x39b   : > { %v522_v54 = vmul.f32 %v1247_v53, %v515_v21 }
 0x39d   : > { %v523_v56 = vpack.c.bf16 %v522_v54, %v522_v54 }
 0x3c9   : > { %v627_v30 = vpop.f32.mrb[12].mxu1 }
 0x3ca   : > { %v634_v32 = vmul.f32 %v1241_v29, %v627_v30  ;;  %v1137_v33 = vpop.f32.mrb[13].mxu1 }
 0x3cb   : > { %v630_v34 = vpop.f32.mrb[14].mxu1 }
 0x3cc   : > { %v635_v37 = vpack.c.bf16 %v634_v32, %v634_v32  ;;  %v1138_v38 = vpop.f32.mrb[15].mxu1 }
 0x3ce   : > { %859 = vrot.lane.b32.xlu1 %v635_v37, %s1319_s18  ;;  %s257_s18 = scalar_lea.vmem [#allocation2], %s1039_s14 }
 0x3d1   : > { %v738_v40 = vpop.f32.mrb[16].mxu1 }
 0x3d2   : > { %v745_v41 = vmul.f32 %v1243_v39, %v738_v40  ;;  %v1149_v42 = vpop.f32.mrb[17].mxu1 }
 0x3d3   : > { %v741_v43 = vpop.f32.mrb[18].mxu1 }
 0x3d4   : > { %v746_v44 = vpack.c.bf16 %v745_v41, %v745_v41  ;;  %v1150_v45 = vpop.f32.mrb[19].mxu1 }
 0x3d6   : > { %862 = vrot.lane.b32.xlu0 %v746_v44, %s1318_s17  ;;  %s1065_s17 = sshll.u32 %s1378_s25, 7  ;;  %s951_s25 = scalar_lea.sflag [#allocation3], %s255_s13 }
 0x3d7   : > { %s1532_s28 = scalar_lea.hbm %s1581_s6, %s1065_s17 }
 0x3d9   : > { %v849_v47 = vpop.f32.mrb[20].mxu1 }
 0x3da   : > { %v856_v48 = vmul.f32 %v1245_v46, %v849_v47  ;;  %v1161_v49 = vpop.f32.mrb[21].mxu1 }
 0x3db   : > { %v852_v50 = vpop.f32.mrb[22].mxu1 }
 0x3dc   : > { %v857_v51 = vpack.c.bf16 %v856_v48, %v856_v48  ;;  %v1162_v1 = vpop.f32.mrb[23].mxu1 }
 0x3de   : > { %865 = vrot.lane.b32.xlu1 %v857_v51, %s1320_s19  ;;  %s964_s19 = sshll.u32 %s257_s18, 4  ;;  %s1534_s19 = int_to_ptr.vmem [resolvable:$true] %s964_s19 }
 0x3df   : > { %s1248_s29 = scalar_lea.vmem %s1534_s19, 128  ;;  %p1255_p0 = scmp.lt.s32.totalorder %s1534_s19, %s1253_s10 }
 0x3e0   : > { %p1249_p11 = scmp.ne.s32.totalorder %s1534_s19, %s1248_s29  ;;  %p1256_p1 = scmp.lt.s32.totalorder %s1254_s11, %s1248_s29 }
 0x3e2   : > { %p1250_p12 = pnand %p1249_p11, %p1395_p5  ;;  %p1257_p2 = por %p1256_p1, %p1255_p0 }
 0x3e4   : > { %p1251_p13 = pneg %p1250_p12 }
 0x3e6   : > { %p1258_p3 = pnand %p1257_p2, %p1251_p13 }
 0x440   : > { %v860_v55 = vpop.permute.xlu1 %859 }
 0x441   : > { %v869_v58 = vsel %vm413_vm3, %v523_v56, %v860_v55 }
 0x448   : > { %v863_v57 = vpop.permute.xlu0 %862 }
 0x449   : > { %v871_v59 = vsel %vm300_vm1, %v869_v58, %v863_v57 }
 0x450   : > { %v866_v60 = vpop.permute.xlu1 %865 }
 0x451   : > { %v873_v61 = vsel %vm367_vm2, %v871_v59, %v866_v60 }
 0x452   : > { %1172 = vmatmul.mubr.msk.bf16.vlgmr.msra.gmra.mrb[16].mxu0 %vm898_vm6, %v873_v61 }
 0x525   : > { %v935_v63 = vpop.f32.mrb[16].mxu0 }
 0x526   : > { %v948_v0 = vadd.f32 %v1063_v62, %v935_v63  ;;  %v1173_v2 = vpop.f32.mrb[17].mxu0 }
 0x527   : > { %v938_v3 = vpop.f32.mrb[18].mxu0 }
 0x528   : > { %v1174_v4 = vpop.f32.mrb[19].mxu0  ;;  %949 = vst.msk [vmem:[%s257_s18] sm:$0xff] %vm300_vm1, %v948_v0 }
 0x529   : > { %1261 = shalt.err (!%p1258_p3)
}
 0x52a   : > { %s1262_s12 = scalar_lea.hbm %s1532_s28, 128  ;;  %s1266_s15 = scalar_lea.hbm %s1581_s6, 256 }
 0x52b   : > { %p1263_p4 = scmp.ne.s32.totalorder %s1532_s28, %s1262_s12  ;;  %p1267_p9 = scmp.lt.u32.totalorder %s1532_s28, %s1581_s6 }
 0x52c   : > { %p1268_p10 = scmp.lt.u32.totalorder %s1266_s15, %s1262_s12  ;;  %p1270_p12 = scmp.lt.u32.totalorder %s1262_s12, %s1532_s28 }
 0x52d   : > { %p1264_p7 = pnand %p1263_p4, %p1395_p5 }
 0x52e   : > { %p1269_p11 = por %p1268_p10, %p1267_p9 }
 0x52f   : > { %p1265_p8 = pneg %p1264_p7 }
 0x530   : > { %p1271_p13 = por %p1270_p12, %p1269_p11 }
 0x532   : > { %p1272_p0 = pnand %p1271_p13, %p1265_p8 }
 0x534   : > { %1275 = shalt.err (!%p1272_p0)
}
 0x535   : > { %1175 = dma.vmem_to_hbm [thread:$0]  (%p1395_p5), %s1534_s19, 128, %s1532_s28, %s951_s25  }
 0x536 PF: > { %p1181_p1 = scmp.ge.s32.totalorder %s1310_s24, 2  ;;  %s976_s18 = sand.u32 1, %s1298_s21  }
 0x537   : > { %s977_s20 = scalar_lea.sflag [#allocation3], %s976_s18 }
 0x538   : > { %p1178_p2 = pnand %p1181_p1, %p1399_p6 }
 0x53a   : > { %1293 = dma.done.wait (!%p1178_p2), %s977_s20, 128  }
 0x53b   : > { %1295 = vsyncadd (!%p1178_p2), %s977_s20, 4294967168  ;;  %p16_p3 = scmp.ge.s32.totalorder %s1382_s27, 4   ;;  %s1584_s21 = smov %s1302_s22 }
 0x53c   : > { %s1585_s22 = smov %s1306_s23  ;;  %s1586_s23 = smov %s1393_s30 }
 0x53d   : > { %s1587_s24 = smov %s1382_s27  ;;  %18 = sbr.rel (!%p16_p3) target bundleno = 3 (0x3), region = 82 }
 0x544   :  { %982 = vsyncpa [#allocation3], 1 }
 0x545   :  { %984 = vsyncpa [#allocation3 + $0x1], 1 }

</bundles_post_ra>
